<compile_context>
chip_gen: v7x
topology: tpu7x:2x2x1
jax: 0.10.0
libtpu: 0.0.40
codegen_flags: <defaults>
</compile_context>

<pallas_src>
import functools

import jax
import jax.numpy as jnp
from jax.experimental import pallas as pl
from jax.experimental.pallas import tpu as pltpu

EPS = 1e-5
_VMEM_LIMIT = 48 * 1024 * 1024   # scoped VMEM cap; stays under v7x's 64 MiB physical


def _stats_kernel(xh_ref, w2_ref, sum_ref, sq_ref, *, K, TL):
    """Pass 1: accumulate per-channel sum / sum-of-squares of the fused conv output."""
    @pl.when((pl.program_id(0) == 0) & (pl.program_id(1) == 0))
    def _():
        sum_ref[...] = jnp.zeros_like(sum_ref)
        sq_ref[...] = jnp.zeros_like(sq_ref)

    xh = xh_ref[...].astype(jnp.float32)                                   # (C, TL+K-1)
    xwin = jnp.concatenate([xh[:, k:k + TL] for k in range(K)], axis=0)    # (K*C, TL)
    z = jnp.dot(w2_ref[...], xwin, preferred_element_type=jnp.float32)     # (2C, TL)
    sum_ref[...] += jnp.sum(z, axis=-1, keepdims=True)
    sq_ref[...] += jnp.sum(z * z, axis=-1, keepdims=True)


def _apply_kernel(xh_ref, xc_ref, w2_ref, scale_ref, shift_ref, o_ref, *, K, TL, C):
    """Pass 2: conv -> folded BN affine -> sigmoid/relu -> highway gate, per tile."""
    xh = xh_ref[...].astype(jnp.float32)                                   # (C, TL+K-1)
    xwin = jnp.concatenate([xh[:, k:k + TL] for k in range(K)], axis=0)    # (K*C, TL)
    z = jnp.dot(w2_ref[...], xwin, preferred_element_type=jnp.float32)     # (2C, TL)
    y = z * scale_ref[...] + shift_ref[...]                                # folded BN
    t = 0.5 * jnp.tanh(0.5 * y[:C, :]) + 0.5                               # sigmoid (1 EUP op)
    hid = jnp.maximum(y[C:, :], 0.0)                                       # relu branch
    x = xc_ref[...].astype(jnp.float32)                                    # (C, TL) carry
    o_ref[...] = (x + t * (hid - x)).astype(o_ref.dtype)                   # t*h + (1-t)*x


def _pick_tile(L):
    """Pick an L-tile: whole L for small sequences, else a lane-aligned divisor."""
    if L <= 512:
        return L
    for tl in (512, 384, 256, 128):
        if L % tl == 0:
            return tl
    return L


@jax.jit
def highway_cnn_block(x_ncl, w_t, b_t, g_t, be_t, w_h, b_h, g_h, be_h):
    """x_ncl: (N, C, L) float32, PyTorch Conv1d layout. Returns (N, C, L)."""
    N, C, L = x_ncl.shape
    K = w_t.shape[-1]                       # PyTorch Conv1d weight layout (Cout, Cin, K)
    pad_l = (K - 1) // 2
    pad_r = (K - 1) - pad_l
    TL = _pick_tile(L)
    num_tiles = L // TL
    THALO = TL + K - 1

    # 'same'-padded input, channel-major, cut into per-tile halo blocks.
    # Only K-1 halo lanes per tile are duplicated (vs the old K-fold im2col).
    x_pad = jnp.pad(x_ncl, ((0, 0), (0, 0), (pad_l, pad_r)))               # (N, C, L+K-1)
    x_halo = jnp.stack(
        [x_pad[:, :, t * TL:t * TL + THALO] for t in range(num_tiles)],
        axis=1)                                                            # (N, T, C, THALO)

    # Fuse both branches' conv weights: (2C, K*C) with column index k*C + cin.
    w2 = jnp.concatenate(
        [w_t.transpose(0, 2, 1).reshape(C, K * C),
         w_h.transpose(0, 2, 1).reshape(C, K * C)], axis=0).astype(jnp.float32)

    grid = (N, num_tiles)
    halo_spec = pl.BlockSpec((None, None, C, THALO), lambda n, t: (n, t, 0, 0))
    w2_spec = pl.BlockSpec((2 * C, K * C), lambda n, t: (0, 0))            # resident
    col_spec = pl.BlockSpec((2 * C, 1), lambda n, t: (0, 0))               # resident / accum

    # ---- pass 1: global BatchNorm statistics of the (bias-free) conv output ----
    sum_z, sq_z = pl.pallas_call(
        functools.partial(_stats_kernel, K=K, TL=TL),
        out_shape=(jax.ShapeDtypeStruct((2 * C, 1), jnp.float32),
                   jax.ShapeDtypeStruct((2 * C, 1), jnp.float32)),
        grid=grid,
        in_specs=[halo_spec, w2_spec],
        out_specs=(col_spec, col_spec),
        compiler_params=pltpu.CompilerParams(
            dimension_semantics=("arbitrary", "arbitrary"),
            vmem_limit_bytes=_VMEM_LIMIT),
    )(x_halo, w2)

    # Fold BN (training-mode batch stats, biased variance) + gamma/beta into scale/shift.
    # Conv bias cancels: (z + b) - mean(z + b) == z - mean(z); b_t / b_h are thus unused.
    cnt = jnp.float32(N * L)
    mean_z = sum_z[:, 0] / cnt
    var_z = jnp.maximum(sq_z[:, 0] / cnt - mean_z * mean_z, 0.0)           # clamp >= 0
    gamma2 = jnp.concatenate([g_t, g_h]).astype(jnp.float32)
    beta2 = jnp.concatenate([be_t, be_h]).astype(jnp.float32)
    scale = gamma2 * jax.lax.rsqrt(var_z + EPS)
    shift = beta2 - mean_z * scale
    scale2 = scale.reshape(2 * C, 1)
    shift2 = shift.reshape(2 * C, 1)

    # ---- pass 2: normalize, gate and combine with the carry path ----
    out = pl.pallas_call(
        functools.partial(_apply_kernel, K=K, TL=TL, C=C),
        out_shape=jax.ShapeDtypeStruct((N, C, L), x_ncl.dtype),
        grid=grid,
        in_specs=[
            halo_spec,
            pl.BlockSpec((None, C, TL), lambda n, t: (n, 0, t)),           # carry x
            w2_spec, col_spec, col_spec,
        ],
        out_specs=pl.BlockSpec((None, C, TL), lambda n, t: (n, 0, t)),
        compiler_params=pltpu.CompilerParams(
            dimension_semantics=("parallel", "parallel"),
            vmem_limit_bytes=_VMEM_LIMIT),
    )(x_halo, x_ncl, w2, scale2, shift2)
    return out


def _reference(x_ncl, w_t, b_t, g_t, be_t, w_h, b_h, g_h, be_h):
    """Pure-JAX reference of the intended forward pass (for a sanity check)."""
    K = w_t.shape[-1]
    pad_l = (K - 1) // 2
    pad_r = (K - 1) - pad_l

    def conv_bn(x, w, b, g, be):
        y = jax.lax.conv_general_dilated(
            x, w, window_strides=(1,), padding=[(pad_l, pad_r)],
            dimension_numbers=("NCH", "OIH", "NCH"))
        y = y + b[None, :, None]
        mu = jnp.mean(y, axis=(0, 2), keepdims=True)
        var = jnp.mean((y - mu) ** 2, axis=(0, 2), keepdims=True)
        yn = (y - mu) * jax.lax.rsqrt(var + EPS)
        return yn * g[None, :, None] + be[None, :, None]

    t = jax.nn.sigmoid(conv_bn(x_ncl, w_t, b_t, g_t, be_t))
    h = jax.nn.relu(conv_bn(x_ncl, w_h, b_h, g_h, be_h))
    return t * h + (1.0 - t) * x_ncl


def init_params(key, C, K):
    k1, k2, k3, k4 = jax.random.split(key, 4)
    bound = 1.0 / (C * K) ** 0.5            # PyTorch Conv1d default init bounds
    w_t = jax.random.uniform(k1, (C, C, K), jnp.float32, -bound, bound)
    b_t = jax.random.uniform(k2, (C,), jnp.float32, -bound, bound)
    w_h = jax.random.uniform(k3, (C, C, K), jnp.float32, -bound, bound)
    b_h = jax.random.uniform(k4, (C,), jnp.float32, -bound, bound)
    gamma = jnp.ones((C,), jnp.float32)      # BatchNorm1d default init
    beta = jnp.zeros((C,), jnp.float32)
    return w_t, b_t, gamma, beta, w_h, b_h, gamma, beta


if __name__ == "__main__":
    N, C, L, K = 2, 8, 16, 3
    key = jax.random.PRNGKey(0)
    kx, kp = jax.random.split(key)
    x = jax.random.normal(kx, (N, C, L), jnp.float32)
    params = init_params(kp, C, K)

    y = highway_cnn_block(x, *params)
    jax.block_until_ready(y)

    y_ref = _reference(x, *params)
    assert y.shape == (N, C, L)
    assert jnp.allclose(y, y_ref, atol=2e-3, rtol=2e-3), "mismatch vs pure-JAX reference"
    print("KERNEL_OK")
</pallas_src>

<mosaic_0001>
module attributes {stable_mosaic.version = 11 : i64} {
  func.func @_stats_kernel(%arg0: i32, %arg1: i32, %arg2: memref<1x1x8x18xf32, #tpu.memory_space<vmem>>, %arg3: memref<16x24xf32, #tpu.memory_space<vmem>>, %arg4: memref<16x1xf32, #tpu.memory_space<vmem>>, %arg5: memref<16x1xf32, #tpu.memory_space<vmem>>) attributes {dimension_semantics = [#tpu.dimension_semantics<arbitrary>, #tpu.dimension_semantics<arbitrary>], iteration_bounds = array<i64: 2, 1>, scalar_prefetch = 0 : i64, scratch_operands = 0 : i64, tpu.core_type = #tpu.core_type<tc>, window_params = [{transform_indices = @transform_0, window_bounds = array<i64: 1, 1, 8, 18>}, {pipeline_mode = #tpu.pipeline_mode<synchronous>, transform_indices = @transform_1, window_bounds = array<i64: 16, 24>}, {pipeline_mode = #tpu.pipeline_mode<synchronous>, transform_indices = @transform_2, window_bounds = array<i64: 16, 1>}, {pipeline_mode = #tpu.pipeline_mode<synchronous>, transform_indices = @transform_3, window_bounds = array<i64: 16, 1>}]} {
    %c0_i32 = arith.constant 0 : i32
    %0 = arith.cmpi eq, %arg0, %c0_i32 : i32
    %c0_i32_0 = arith.constant 0 : i32
    %1 = arith.cmpi eq, %arg1, %c0_i32_0 : i32
    %2 = arith.andi %0, %1 : i1
    %3 = arith.extui %2 : i1 to i32
    %c0_i32_1 = arith.constant 0 : i32
    %4 = arith.cmpi ne, %3, %c0_i32_1 : i32
    scf.if %4 {
      %cst_17 = arith.constant 0.000000e+00 : f32
      %24 = vector.broadcast %cst_17 : f32 to vector<16x1xf32>
      %c0_18 = arith.constant 0 : index
      %c0_19 = arith.constant 0 : index
      %25 = vector.load %arg4[%c0_18, %c0_19] : memref<16x1xf32, #tpu.memory_space<vmem>>, vector<16x1xf32>
      tpu.vector_store %arg4[%c0_18, %c0_19], %24 {strides = array<i32>} : memref<16x1xf32, #tpu.memory_space<vmem>>, vector<16x1xf32>,
      %cst_20 = arith.constant 0.000000e+00 : f32
      %26 = vector.broadcast %cst_20 : f32 to vector<16x1xf32>
      %c0_21 = arith.constant 0 : index
      %c0_22 = arith.constant 0 : index
      %27 = vector.load %arg5[%c0_21, %c0_22] : memref<16x1xf32, #tpu.memory_space<vmem>>, vector<16x1xf32>
      tpu.vector_store %arg5[%c0_21, %c0_22], %26 {strides = array<i32>} : memref<16x1xf32, #tpu.memory_space<vmem>>, vector<16x1xf32>,
    } else {
    }
    %c0 = arith.constant 0 : index
    %c0_2 = arith.constant 0 : index
    %c0_3 = arith.constant 0 : index
    %c0_4 = arith.constant 0 : index
    %5 = vector.load %arg2[%c0, %c0_2, %c0_3, %c0_4] : memref<1x1x8x18xf32, #tpu.memory_space<vmem>>, vector<1x1x8x18xf32>
    %6 = vector.shape_cast %5 : vector<1x1x8x18xf32> to vector<8x18xf32>
    %7 = vector.extract_strided_slice %6 {offsets = [0, 0], sizes = [8, 16], strides = [1, 1]} : vector<8x18xf32> to vector<8x16xf32>
    %8 = vector.extract_strided_slice %6 {offsets = [0, 1], sizes = [8, 16], strides = [1, 1]} : vector<8x18xf32> to vector<8x16xf32>
    %9 = vector.extract_strided_slice %6 {offsets = [0, 2], sizes = [8, 16], strides = [1, 1]} : vector<8x18xf32> to vector<8x16xf32>
    %10 = tpu.concatenate %7, %8, %9 in 0 : vector<8x16xf32>, vector<8x16xf32>, vector<8x16xf32> -> vector<24x16xf32>
    %c0_5 = arith.constant 0 : index
    %c0_6 = arith.constant 0 : index
    %11 = vector.load %arg3[%c0_5, %c0_6] : memref<16x24xf32, #tpu.memory_space<vmem>>, vector<16x24xf32>
    %cst = arith.constant dense<0.000000e+00> : vector<16x16xf32>
    %12 = tpu.matmul %11, %10, %cst {dimension_numbers = #tpu.dot_dimension_numbers<[1], [0], [0], [1], [0, 0, 1, 1], [], []>} : vector<16x24xf32>, vector<24x16xf32>, vector<16x16xf32> -> vector<16x16xf32>
    %c0_7 = arith.constant 0 : index
    %c0_8 = arith.constant 0 : index
    %13 = vector.load %arg4[%c0_7, %c0_8] : memref<16x1xf32, #tpu.memory_space<vmem>>, vector<16x1xf32>
    %cst_9 = arith.constant dense<0.000000e+00> : vector<16xf32>
    %14 = vector.multi_reduction <add>, %12, %cst_9 [1] : vector<16x16xf32> to vector<16xf32>
    %15 = vector.shape_cast %14 : vector<16xf32> to vector<16x1xf32>
    %16 = arith.addf %13, %15 : vector<16x1xf32>
    %c0_10 = arith.constant 0 : index
    %c0_11 = arith.constant 0 : index
    %17 = vector.load %arg4[%c0_10, %c0_11] : memref<16x1xf32, #tpu.memory_space<vmem>>, vector<16x1xf32>
    tpu.vector_store %arg4[%c0_10, %c0_11], %16 {strides = array<i32>} : memref<16x1xf32, #tpu.memory_space<vmem>>, vector<16x1xf32>,
    %c0_12 = arith.constant 0 : index
    %c0_13 = arith.constant 0 : index
    %18 = vector.load %arg5[%c0_12, %c0_13] : memref<16x1xf32, #tpu.memory_space<vmem>>, vector<16x1xf32>
    %19 = arith.mulf %12, %12 : vector<16x16xf32>
    %cst_14 = arith.constant dense<0.000000e+00> : vector<16xf32>
    %20 = vector.multi_reduction <add>, %19, %cst_14 [1] : vector<16x16xf32> to vector<16xf32>
    %21 = vector.shape_cast %20 : vector<16xf32> to vector<16x1xf32>
    %22 = arith.addf %18, %21 : vector<16x1xf32>
    %c0_15 = arith.constant 0 : index
    %c0_16 = arith.constant 0 : index
    %23 = vector.load %arg5[%c0_15, %c0_16] : memref<16x1xf32, #tpu.memory_space<vmem>>, vector<16x1xf32>
    tpu.vector_store %arg5[%c0_15, %c0_16], %22 {strides = array<i32>} : memref<16x1xf32, #tpu.memory_space<vmem>>, vector<16x1xf32>,
    return
  }
  func.func @transform_0(%arg0: i32, %arg1: i32) -> (i32, i32, i32, i32) {
    %c0_i32 = arith.constant 0 : i32
    %c0_i32_0 = arith.constant 0 : i32
    %c0_i32_1 = arith.constant 0 : i32
    return %arg0, %arg1, %c0_i32, %c0_i32_0 : i32, i32, i32, i32
  }
  func.func @transform_1(%arg0: i32, %arg1: i32) -> (i32, i32) {
    %c0_i32 = arith.constant 0 : i32
    %c0_i32_0 = arith.constant 0 : i32
    %c0_i32_1 = arith.constant 0 : i32
    return %c0_i32, %c0_i32_0 : i32, i32
  }
  func.func @transform_2(%arg0: i32, %arg1: i32) -> (i32, i32) {
    %c0_i32 = arith.constant 0 : i32
    %c0_i32_0 = arith.constant 0 : i32
    %c0_i32_1 = arith.constant 0 : i32
    return %c0_i32, %c0_i32_0 : i32, i32
  }
  func.func @transform_3(%arg0: i32, %arg1: i32) -> (i32, i32) {
    %c0_i32 = arith.constant 0 : i32
    %c0_i32_0 = arith.constant 0 : i32
    %c0_i32_1 = arith.constant 0 : i32
    return %c0_i32, %c0_i32_0 : i32, i32
  }
}

module attributes {stable_mosaic.version = 11 : i64} {
  func.func @_apply_kernel(%arg0: i32, %arg1: i32, %arg2: memref<1x1x8x18xf32, #tpu.memory_space<vmem>>, %arg3: memref<1x8x16xf32, #tpu.memory_space<vmem>>, %arg4: memref<16x24xf32, #tpu.memory_space<vmem>>, %arg5: memref<16x1xf32, #tpu.memory_space<vmem>>, %arg6: memref<16x1xf32, #tpu.memory_space<vmem>>, %arg7: memref<1x8x16xf32, #tpu.memory_space<vmem>>) attributes {dimension_semantics = [#tpu.dimension_semantics<parallel>, #tpu.dimension_semantics<parallel>], iteration_bounds = array<i64: 2, 1>, scalar_prefetch = 0 : i64, scratch_operands = 0 : i64, tpu.core_type = #tpu.core_type<tc>, window_params = [{transform_indices = @transform_0, window_bounds = array<i64: 1, 1, 8, 18>}, {transform_indices = @transform_1, window_bounds = array<i64: 1, 8, 16>}, {pipeline_mode = #tpu.pipeline_mode<synchronous>, transform_indices = @transform_2, window_bounds = array<i64: 16, 24>}, {pipeline_mode = #tpu.pipeline_mode<synchronous>, transform_indices = @transform_3, window_bounds = array<i64: 16, 1>}, {pipeline_mode = #tpu.pipeline_mode<synchronous>, transform_indices = @transform_4, window_bounds = array<i64: 16, 1>}, {transform_indices = @transform_5, window_bounds = array<i64: 1, 8, 16>}]} {
    %c0 = arith.constant 0 : index
    %c0_0 = arith.constant 0 : index
    %c0_1 = arith.constant 0 : index
    %c0_2 = arith.constant 0 : index
    %0 = vector.load %arg2[%c0, %c0_0, %c0_1, %c0_2] : memref<1x1x8x18xf32, #tpu.memory_space<vmem>>, vector<1x1x8x18xf32>
    %1 = vector.shape_cast %0 : vector<1x1x8x18xf32> to vector<8x18xf32>
    %2 = vector.extract_strided_slice %1 {offsets = [0, 0], sizes = [8, 16], strides = [1, 1]} : vector<8x18xf32> to vector<8x16xf32>
    %3 = vector.extract_strided_slice %1 {offsets = [0, 1], sizes = [8, 16], strides = [1, 1]} : vector<8x18xf32> to vector<8x16xf32>
    %4 = vector.extract_strided_slice %1 {offsets = [0, 2], sizes = [8, 16], strides = [1, 1]} : vector<8x18xf32> to vector<8x16xf32>
    %5 = tpu.concatenate %2, %3, %4 in 0 : vector<8x16xf32>, vector<8x16xf32>, vector<8x16xf32> -> vector<24x16xf32>
    %c0_3 = arith.constant 0 : index
    %c0_4 = arith.constant 0 : index
    %6 = vector.load %arg4[%c0_3, %c0_4] : memref<16x24xf32, #tpu.memory_space<vmem>>, vector<16x24xf32>
    %cst = arith.constant dense<0.000000e+00> : vector<16x16xf32>
    %7 = tpu.matmul %6, %5, %cst {dimension_numbers = #tpu.dot_dimension_numbers<[1], [0], [0], [1], [0, 0, 1, 1], [], []>} : vector<16x24xf32>, vector<24x16xf32>, vector<16x16xf32> -> vector<16x16xf32>
    %c0_5 = arith.constant 0 : index
    %c0_6 = arith.constant 0 : index
    %8 = vector.load %arg5[%c0_5, %c0_6] : memref<16x1xf32, #tpu.memory_space<vmem>>, vector<16x1xf32>
    %9 = vector.broadcast %8 : vector<16x1xf32> to vector<16x16xf32>
    %10 = arith.mulf %7, %9 : vector<16x16xf32>
    %c0_7 = arith.constant 0 : index
    %c0_8 = arith.constant 0 : index
    %11 = vector.load %arg6[%c0_7, %c0_8] : memref<16x1xf32, #tpu.memory_space<vmem>>, vector<16x1xf32>
    %12 = vector.broadcast %11 : vector<16x1xf32> to vector<16x16xf32>
    %13 = arith.addf %10, %12 : vector<16x16xf32>
    %14 = vector.extract_strided_slice %13 {offsets = [0, 0], sizes = [8, 16], strides = [1, 1]} : vector<16x16xf32> to vector<8x16xf32>
    %cst_9 = arith.constant 5.000000e-01 : f32
    %15 = vector.broadcast %cst_9 : f32 to vector<8x16xf32>
    %16 = arith.mulf %15, %14 : vector<8x16xf32>
    %17 = math.tanh %16 : vector<8x16xf32>
    %cst_10 = arith.constant 5.000000e-01 : f32
    %18 = vector.broadcast %cst_10 : f32 to vector<8x16xf32>
    %19 = arith.mulf %18, %17 : vector<8x16xf32>
    %cst_11 = arith.constant 5.000000e-01 : f32
    %20 = vector.broadcast %cst_11 : f32 to vector<8x16xf32>
    %21 = arith.addf %19, %20 : vector<8x16xf32>
    %22 = vector.extract_strided_slice %13 {offsets = [8, 0], sizes = [8, 16], strides = [1, 1]} : vector<16x16xf32> to vector<8x16xf32>
    %cst_12 = arith.constant 0.000000e+00 : f32
    %23 = vector.broadcast %cst_12 : f32 to vector<8x16xf32>
    %24 = arith.maximumf %22, %23 : vector<8x16xf32>
    %c0_13 = arith.constant 0 : index
    %c0_14 = arith.constant 0 : index
    %c0_15 = arith.constant 0 : index
    %25 = vector.load %arg3[%c0_13, %c0_14, %c0_15] : memref<1x8x16xf32, #tpu.memory_space<vmem>>, vector<1x8x16xf32>
    %26 = vector.shape_cast %25 : vector<1x8x16xf32> to vector<8x16xf32>
    %27 = arith.subf %24, %26 : vector<8x16xf32>
    %28 = arith.mulf %21, %27 : vector<8x16xf32>
    %29 = arith.addf %26, %28 : vector<8x16xf32>
    %c0_16 = arith.constant 0 : index
    %c0_17 = arith.constant 0 : index
    %c0_18 = arith.constant 0 : index
    %30 = vector.load %arg7[%c0_16, %c0_17, %c0_18] : memref<1x8x16xf32, #tpu.memory_space<vmem>>, vector<1x8x16xf32>
    %31 = vector.shape_cast %30 : vector<1x8x16xf32> to vector<8x16xf32>
    %32 = vector.shape_cast %29 : vector<8x16xf32> to vector<1x8x16xf32>
    tpu.vector_store %arg7[%c0_16, %c0_17, %c0_18], %32 {strides = array<i32>} : memref<1x8x16xf32, #tpu.memory_space<vmem>>, vector<1x8x16xf32>,
    return
  }
  func.func @transform_0(%arg0: i32, %arg1: i32) -> (i32, i32, i32, i32) {
    %c0_i32 = arith.constant 0 : i32
    %c0_i32_0 = arith.constant 0 : i32
    %c0_i32_1 = arith.constant 0 : i32
    return %arg0, %arg1, %c0_i32, %c0_i32_0 : i32, i32, i32, i32
  }
  func.func @transform_1(%arg0: i32, %arg1: i32) -> (i32, i32, i32) {
    %c0_i32 = arith.constant 0 : i32
    %c0_i32_0 = arith.constant 0 : i32
    return %arg0, %c0_i32, %arg1 : i32, i32, i32
  }
  func.func @transform_2(%arg0: i32, %arg1: i32) -> (i32, i32) {
    %c0_i32 = arith.constant 0 : i32
    %c0_i32_0 = arith.constant 0 : i32
    %c0_i32_1 = arith.constant 0 : i32
    return %c0_i32, %c0_i32_0 : i32, i32
  }
  func.func @transform_3(%arg0: i32, %arg1: i32) -> (i32, i32) {
    %c0_i32 = arith.constant 0 : i32
    %c0_i32_0 = arith.constant 0 : i32
    %c0_i32_1 = arith.constant 0 : i32
    return %c0_i32, %c0_i32_0 : i32, i32
  }
  func.func @transform_4(%arg0: i32, %arg1: i32) -> (i32, i32) {
    %c0_i32 = arith.constant 0 : i32
    %c0_i32_0 = arith.constant 0 : i32
    %c0_i32_1 = arith.constant 0 : i32
    return %c0_i32, %c0_i32_0 : i32, i32
  }
  func.func @transform_5(%arg0: i32, %arg1: i32) -> (i32, i32, i32) {
    %c0_i32 = arith.constant 0 : i32
    %c0_i32_0 = arith.constant 0 : i32
    return %arg0, %c0_i32, %arg1 : i32, i32, i32
  }
}

</mosaic_0001>

<bundles_post_ra>
// kernel: highway_cnn_block.3
= control target key start
LH: loop header
LB: loop body
LE: loop exit
PB: predicated region body
PF: predicated region fallthrough
CT: control target
= control target key end

     0   :  { %10 = vsyncpa [#allocation3], 0  ;;  %s851_s0 = inlined_call_operand.vmem [shape: f32[2,1,8,18], index: 0, kind: input, shape index: {}]   ;;  %s852_s1 = inlined_call_operand.vmem [shape: f32[2,8,16], index: 1, kind: input, shape index: {}]   ;;  %s853_s2 = inlined_call_operand.vmem [shape: f32[16,24], index: 2, kind: input, shape index: {}]   ;;  %s854_s3 = inlined_call_operand.vmem [shape: f32[16,1], index: 3, kind: input, shape index: {}]   ;;  %s855_s4 = inlined_call_operand.vmem [shape: f32[16,1], index: 4, kind: input, shape index: {}]   ;;  %s856_s5 = inlined_call_operand.hbm [shape: f32[2,8,16], index: 5, kind: output, shape index: {}]  }
   0x1   :  { %12 = vsyncpa [#allocation3 + $0x1], 0  ;;  %s713_s18 = smov 0   ;;  %s715_s19 = smov 0  }
   0x2   :  { %s717_s20 = smov 0   ;;  %s719_s21 = smov 0  }
   0x3   :  { %s721_s22 = smov 0   ;;  %s723_s23 = smov 0  }
   0x4 LB: > { %s505_s24 = sadd.s32 4294967295, %s677_s23   ;;  %s506_s25 = sadd.s32 4294967294, %s677_s23   ;;  %s677_s23 = sphi %s723_s23, %s18_s23   ;;  %s673_s22 = sphi %s721_s22, %s863_s22   ;;  %s669_s21 = sphi %s719_s21, %s862_s21   ;;  %s665_s20 = sphi %s717_s20, %s861_s20   ;;  %s661_s19 = sphi %s715_s19, %s860_s19   ;;  %s657_s18 = sphi %s713_s18, %s859_s18  }
   0x5   : > { %s30_s26 = sadd.s32 1, %s673_s22  ;;  %s158_s27 = sadd.s32 1, %s665_s20 }
   0x6   : > { %p32_p0 = scmp.ge.s32.totalorder %s30_s26, 2  ;;  %p168_p1 = scmp.ne.s32.totalorder %s665_s20, %s661_s19 }
   0x7   : > { %p169_p2 = scmp.eq.s32.totalorder %s505_s24, 1  ;;  %p174_p3 = scmp.ne.s32.totalorder %s661_s19, %s657_s18 }
   0x8   : > { %s865_s26 = smov (%p32_p0, %s30_s26), 0  ;;  %p175_p5 = scmp.eq.s32.totalorder %s506_s25, 1 }
   0x9   : > { %p753_p4 = por %p169_p2, %p168_p1  ;;  %s153_s29 = ssub.s32 %s673_s22, %s865_s26 }
   0xa   : > { %p509_p6 = scmp.ge.s32.totalorder %s677_s23, 1  ;;  %p156_p7 = scmp.eq.s32.totalorder %s153_s29, 0 }
   0xb   : > { %p760_p8 = por %p175_p5, %p174_p3  ;;  %p222_p9 = scmp.lt.s32.totalorder %s677_s23, 3 }
   0xc   : > { %s766_s6 = scalar_select %p156_p7, %s665_s20, %s158_s27  }
   0xd   : > { %p223_p10 = pnand %p509_p6, %p222_p9 }
   0xe   : > { %p259_p11 = scmp.lt.s32.totalorder (!%p223_p10), %s669_s21, 1  ;;  %v281_v0 = vld [vmem:[%s853_s2] sm:$0xff] (!%p223_p10)  ;;  %vm283_vm0 = vcmask (!%p223_p10), 195584   ;;  %v679_v2 = vmov (!%p223_p10), 0   ;;  %s680_s24 = smov (!%p223_p10), 127   ;;  %v380_v5 = vld [vmem:[%s855_s4 + $0x8] sm:$0xff] (!%p223_p10) }
   0xf   : > { %226 = sbr.rel (%p223_p10) target bundleno = 402 (0x192), region = 40  ;;  %530 = vmatprep.mubr.msk.f32.mxu0 (!%p223_p10), %vm283_vm0, %v281_v0  ;;  %v365_v1 = vld [vmem:[%s854_s3] sm:$0xff] (!%p223_p10)  ;;  %595 = vset.pattern.permute.xlu1 (!%p223_p10), %v679_v2  ;;  %s681_s29 = smov (!%p223_p10), 126   ;;  %v366_v6 = vld [vmem:[%s854_s3 + $0x8] sm:$0xff] (!%p223_p10)  ;;  %vm402_vm1 = vcmask (!%p223_p10), 130048  }
  0x10   : > { %596 = vset.pattern.permute.xlu0 (!%p223_p10), %v679_v2  ;;  %369 = vperm.xlu1 (!%p223_p10), %595, %v365_v1   ;;  %v379_v3 = vld [vmem:[%s855_s4] sm:$0xff] (!%p223_p10)  ;;  %v282_v10 = vld [vmem:[%s853_s2 + $0x8] sm:$0xff] (!%p223_p10)  ;;  %s516_s17 = sshll.u32 (!%p223_p10), %s669_s21, 7 }
  0x14   : > { %383 = vperm.xlu1 (!%p223_p10), %595, %v379_v3  }
  0x16   : > { %s774_s9 = scalar_select %p259_p11, %s669_s21, 1 }
  0x17   : > { %s682_s21 = smov [#allocation2]  }
  0x18   : > { %s511_s12 = sshll.u32 %s774_s9, 3  ;;  %388 = vperm.xlu1 %595, %v380_v5   ;;  %s603_s9 = sshll.u32 %s682_s21, 4  ;;  %s604_s9 = int_to_ptr.vmem [resolvable:$false] %s603_s9 }
  0x19   : > { %s265_s15 = scalar_lea.vmem %s851_s0, %s511_s12  ;;  %s272_s14 = scalar_lea.vmem %s852_s1, %s511_s12 }
  0x1a   : > { %v273_v4 = vld [vmem:[%s265_s15] sm:$0xff]  ;;  %s256_s15 = sand.u32 1, %s661_s19   ;;  %s605_s10 = scalar_lea.vmem %s604_s9, 256 }
  0x1b   : > { %275 = vrot.lane.b32.xlu0 %v273_v4, %s680_s24  ;;  %v398_v20 = vld [vmem:[%s272_s14] sm:$0xff]  ;;  %s510_s16 = sshll.u32 %s256_s15, 3  ;;  %s405_s7 = scalar_lea.sflag [#allocation3], %s256_s15 }
  0x1c   : > { %s258_s12 = scalar_lea.vmem [#allocation2], %s510_s16 }
  0x1d   : > { %s419_s24 = sshll.u32 %s258_s12, 4  ;;  %s806_s24 = int_to_ptr.vmem [resolvable:$true] %s419_s24 }
  0x1e   : > { %s599_s8 = scalar_lea.vmem %s806_s24, 128  ;;  %p606_p1 = scmp.lt.s32.totalorder %s806_s24, %s604_s9 }
  0x1f   : > { %278 = vrot.lane.b32.xlu0 %v273_v4, %s681_s29  ;;  %s804_s29 = scalar_lea.hbm %s856_s5, %s516_s17  ;;  %p600_p12 = scmp.ne.s32.totalorder %s806_s24, %s599_s8 }
  0x20   : > { %p607_p2 = scmp.lt.s32.totalorder %s605_s10, %s599_s8 }
  0x21   : > { %p601_p13 = pnand %p600_p12, %p753_p4 }
  0x22   : > { %p608_p3 = por %p607_p2, %p606_p1 }
  0x23   : > { %374 = vperm.xlu0 %596, %v366_v6   ;;  %p602_p0 = pneg %p601_p13 }
  0x25   : > { %p609_p5 = pnand %p608_p3, %p602_p0 }
  0x8d   : > { %v276_v7 = vpop.permute.xlu0 %275 }
  0x8e   : > { %v533_v8 = vpack.c.bf16 %v276_v7, %v273_v4 }
  0x8f   : > { %v370_v11 = vpop.permute.xlu1 %369 }
  0x90   : > { %534 = vmatprep.subr.bf16.mxu0 %v533_v8 }
  0x91   : > { %536 = vmatpush3.bf16.msra.mxu0 %v533_v8  ;;  %v279_v9 = vpop.permute.xlu0 %278 }
  0x92   : > { %528 = vmatprep.subr.mxu0 %v279_v9 }
  0x93   : > { %v384_v12 = vpop.permute.xlu1 %383 }
  0x95   : > { %529 = vmatpush3.msra.mxu0 %v279_v9 }
  0x96   : > { %531 = vmatmul.mubr.msk.f32.vlgmr.msra.gmra.mrb[0].mxu0 %vm283_vm0, %v282_v10 }
  0x97   : > { %v389_v17 = vpop.permute.xlu1 %388 }
  0xa2   : > { %v375_v13 = vpop.permute.xlu0 %374 }
 0x169   : > { %v532_v14 = vpop.f32.mrb[0].mxu0 }
 0x16a   : > { %v378_v15 = vmul.f32 %v532_v14, %v375_v13  ;;  %v356_v16 = vpop.f32.mrb[1].mxu0 }
 0x16b   : > { %v377_v18 = vmul.f32 %v370_v11, %v356_v16 }
 0x16c   : > { %v392_v19 = vadd.f32 %v389_v17, %v378_v15 }
 0x16d   : > { %v391_v21 = vadd.f32 %v384_v12, %v377_v18 }
 0x16e   : > { %v397_v22 = vmax.f32 %v392_v19, 0.0 }
 0x16f   : > { %v393_v23 = vmul.f32 0.5, %v391_v21 }
 0x170   : > { %v399_v24 = vsub.f32 %v397_v22, %v398_v20 }
 0x171   : > { %597 = vtanh.f32 %v393_v23 }
 0x17b   : > { %v598_v25 = vpop.eup %597 }
 0x17c   : > { %v395_v26 = vmul.f32 0.5, %v598_v25 }
 0x17e   : > { %v396_v27 = vadd.f32 0.5, %v395_v26 }
 0x180   : > { %v400_v28 = vmul.f32 %v399_v24, %v396_v27 }
 0x182   : > { %v401_v29 = vadd.f32 %v400_v28, %v398_v20 }
 0x184   : > { %403 = vst.msk [vmem:[%s258_s12] sm:$0xff] %vm402_vm1, %v401_v29 }
 0x185   : > { %612 = shalt.err (!%p609_p5)
}
 0x186   : > { %s613_s11 = scalar_lea.hbm %s804_s29, 128  ;;  %s617_s15 = scalar_lea.hbm %s856_s5, 256 }
 0x187   : > { %p614_p6 = scmp.ne.s32.totalorder %s804_s29, %s613_s11  ;;  %p618_p10 = scmp.lt.u32.totalorder %s804_s29, %s856_s5 }
 0x188   : > { %p619_p11 = scmp.lt.u32.totalorder %s617_s15, %s613_s11  ;;  %p621_p13 = scmp.lt.u32.totalorder %s613_s11, %s804_s29 }
 0x189   : > { %p615_p7 = pnand %p614_p6, %p753_p4 }
 0x18a   : > { %p620_p12 = por %p619_p11, %p618_p10 }
 0x18b   : > { %p616_p9 = pneg %p615_p7 }
 0x18c   : > { %p622_p0 = por %p621_p13, %p620_p12 }
 0x18e   : > { %p623_p1 = pnand %p622_p0, %p616_p9 }
 0x190   : > { %626 = shalt.err (!%p623_p1)
}
 0x191   : > { %537 = dma.vmem_to_hbm [thread:$0]  (%p753_p4), %s806_s24, 128, %s804_s29, %s405_s7  }
 0x192 PF: > { %p543_p2 = scmp.ge.s32.totalorder %s677_s23, 2  ;;  %s431_s12 = sand.u32 1, %s657_s18  }
 0x193   : > { %s432_s25 = scalar_lea.sflag [#allocation3], %s431_s12 }
 0x194   : > { %p540_p3 = pnand %p543_p2, %p760_p8 }
 0x196   : > { %652 = dma.done.wait (!%p540_p3), %s432_s25, 128  }
 0x197   : > { %654 = vsyncadd (!%p540_p3), %s432_s25, 4294967168  ;;  %s18_s23 = sadd.s32 1, %s677_s23   ;;  %s859_s18 = smov %s661_s19 }
 0x198   : > { %p15_p5 = scmp.ge.s32.totalorder %s18_s23, 4   ;;  %s860_s19 = smov %s665_s20 }
 0x199   : > { %s861_s20 = smov %s766_s6  ;;  %s862_s21 = smov %s673_s22 }
 0x19a   : > { %s863_s22 = smov %s865_s26  ;;  %17 = sbr.rel (!%p15_p5) target bundleno = 4 (0x4), region = 78 }
 0x1a1   :  { %437 = vsyncpa [#allocation3], 1 }
 0x1a2   :  { %439 = vsyncpa [#allocation3 + $0x1], 1 }

// kernel: highway_cnn_block.2
= control target key start
LH: loop header
LB: loop body
LE: loop exit
PB: predicated region body
PF: predicated region fallthrough
CT: control target
= control target key end

     0   :  { %s453_s12 = smov 0   ;;  %s455_s13 = smov 0   ;;  %s525_s0 = inlined_call_operand.vmem [shape: f32[2,1,8,18], index: 0, kind: input, shape index: {}]   ;;  %s526_s1 = inlined_call_operand.vmem [shape: f32[16,24], index: 1, kind: input, shape index: {}]   ;;  %s527_s2 = inlined_call_operand.vmem [shape: f32[16,1], index: 2, kind: output, shape index: {0}]   ;;  %s528_s3 = inlined_call_operand.vmem [shape: f32[16,1], index: 3, kind: output, shape index: {1}]  }
   0x1   :  { %s457_s14 = smov 0  }
   0x2 LB: > { %s26_s15 = sadd.s32 1, %s424_s13  ;;  %p353_p0 = scmp.ge.s32.totalorder %s428_s14, 1  ;;  %s428_s14 = sphi %s457_s14, %s14_s14   ;;  %s424_s13 = sphi %s455_s13, %s530_s13   ;;  %s420_s12 = sphi %s453_s12, %s529_s12  }
   0x3   : > { %p28_p1 = scmp.ge.s32.totalorder %s26_s15, 2  ;;  %p146_p2 = scmp.lt.s32.totalorder %s428_s14, 3 }
   0x5   : > { %s532_s15 = smov (%p28_p1, %s26_s15), 0  ;;  %p147_p3 = pnand %p353_p0, %p146_p2 }
   0x6   : > { %p167_p4 = scmp.lt.s32.totalorder (!%p147_p3), %s420_s12, 1  ;;  %p174_p5 = scmp.eq.s32.totalorder (!%p147_p3), %s420_s12, 0 }
   0x7   : > { %150 = sbr.rel (%p147_p3) target bundleno = 511 (0x1ff), region = 28 }
   0xe   : > { %s534_s12 = smov (!%p167_p4, %s420_s12), 1  ;;  %179 = sbr.rel (!%p174_p5) target bundleno = 21 (0x15), region = 32 }
   0xf   : > { %s354_s16 = sshll.u32 %s534_s12, 3  ;;  %vm180_vm0 = vcmask (%p174_p5), 7168   ;;  %v430_v0 = vmov (%p174_p5), 0.0  }
  0x10   : > { %s173_s19 = scalar_lea.vmem %s525_s0, %s354_s16  ;;  %181 = vst.msk [vmem:[%s527_s2] sm:$0xff] (%p174_p5), %vm180_vm0, %v430_v0  ;;  %182 = vst.msk [vmem:[%s527_s2 + $0x8] sm:$0xff] (%p174_p5), %vm180_vm0, %v430_v0 }
  0x11   : > { %183 = vst.msk [vmem:[%s528_s3] sm:$0xff] (%p174_p5), %vm180_vm0, %v430_v0  ;;  %184 = vst.msk [vmem:[%s528_s3 + $0x8] sm:$0xff] (%p174_p5), %vm180_vm0, %v430_v0 }
  0x15 PF: > { %v185_v1 = vld [vmem:[%s173_s19] sm:$0xff]  ;;  %vm195_vm1 = vcmask 195584   ;;  %s431_s30 = smov 127   ;;  %s432_s4 = smov 126   ;;  %v194_v6 = vld [vmem:[%s526_s1 + $0x8] sm:$0xff]  ;;  %vm279_vm2 = vcmask 130048  }
  0x16   : > { %v193_v2 = vld [vmem:[%s526_s1] sm:$0xff]  ;;  %187 = vrot.lane.b32.xlu0 %v185_v1, %s431_s30  ;;  %vm288_vm3 = vcmask 7168  }
  0x17   : > { %372 = vmatprep.mubr.msk.f32.mxu0 %vm195_vm1, %v193_v2  ;;  %v278_v15 = vld [vmem:[%s527_s2 + $0x8] sm:$0xff]  ;;  %v277_v19 = vld [vmem:[%s527_s2] sm:$0xff] }
  0x18   : > { %v291_v18 = vld [vmem:[%s528_s3] sm:$0xff]  ;;  %v292_v24 = vld [vmem:[%s528_s3 + $0x8] sm:$0xff] }
  0x1a   : > { %190 = vrot.lane.b32.xlu0 %v185_v1, %s432_s4 }
  0x88   : > { %v188_v3 = vpop.permute.xlu0 %187 }
  0x89   : > { %v375_v4 = vpack.c.bf16 %v188_v3, %v185_v1 }
  0x8b   : > { %376 = vmatprep.subr.bf16.mxu0 %v375_v4 }
  0x8c   : > { %378 = vmatpush3.bf16.msra.mxu0 %v375_v4  ;;  %v191_v5 = vpop.permute.xlu0 %190 }
  0x8d   : > { %370 = vmatprep.subr.mxu0 %v191_v5 }
  0x90   : > { %371 = vmatpush3.msra.mxu0 %v191_v5 }
  0x91   : > { %373 = vmatmul.mubr.msk.f32.vlgmr.msra.gmra.mrb[0].mxu0 %vm195_vm1, %v194_v6 }
 0x164   : > { %v374_v7 = vpop.f32.mrb[0].mxu0 }
 0x165   : > { %v268_v8 = vpop.f32.mrb[1].mxu0  ;;  %v283_v9 = vsel %vm279_vm2, %v374_v7, 0.0  ;;  %v294_v12 = vmul.f32 %v374_v7, %v374_v7 }
 0x166   : > { %v293_v10 = vmul.f32 %v268_v8, %v268_v8  ;;  %284 = vadd.xlane.f32.xlu1 %v283_v9  ;;  %v280_v13 = vsel %vm279_vm2, %v268_v8, 0.0 }
 0x167   : > { %v298_v14 = vsel %vm279_vm2, %v294_v12, 0.0 }
 0x168   : > { %v295_v11 = vsel %vm279_vm2, %v293_v10, 0.0 }
 0x169   : > { %296 = vadd.xlane.f32.xlu0 %v295_v11 }
 0x16a   : > { %281 = vadd.xlane.f32.xlu1 %v280_v13 }
 0x16e   : > { %299 = vadd.xlane.f32.xlu1 %v298_v14 }
 0x1f3   : > { %v285_v16 = vpop.xlane.xlu1 %284 }
 0x1f4   : > { %v287_v17 = vadd.f32 %v285_v16, %v278_v15 }
 0x1f6   : > { %290 = vst.msk [vmem:[%s527_s2 + $0x8] sm:$0xff] %vm288_vm3, %v287_v17  ;;  %v297_v20 = vpop.xlane.xlu0 %296 }
 0x1f7   : > { %v301_v21 = vadd.f32 %v297_v20, %v291_v18  ;;  %v282_v22 = vpop.xlane.xlu1 %281 }
 0x1f8   : > { %v286_v23 = vadd.f32 %v282_v22, %v277_v19 }
 0x1f9   : > { %303 = vst.msk [vmem:[%s528_s3] sm:$0xff] %vm288_vm3, %v301_v21 }
 0x1fa   : > { %289 = vst.msk [vmem:[%s527_s2] sm:$0xff] %vm288_vm3, %v286_v23 }
 0x1fb   : > { %v300_v25 = vpop.xlane.xlu1 %299 }
 0x1fc   : > { %v302_v26 = vadd.f32 %v300_v25, %v292_v24 }
 0x1fe   : > { %304 = vst.msk [vmem:[%s528_s3 + $0x8] sm:$0xff] %vm288_vm3, %v302_v26 }
 0x1ff PF: > { %s14_s14 = sadd.s32 1, %s428_s14   ;;  %s529_s12 = smov %s424_s13 }
 0x200   : > { %p11_p6 = scmp.ge.s32.totalorder %s14_s14, 4   ;;  %s530_s13 = smov %s532_s15 }
 0x202   :  { %13 = sbr.rel (!%p11_p6) target bundleno = 2 (0x2), region = 66 }

</bundles_post_ra>
